<compile_context>
chip_gen: v7x
topology: tpu7x:2x2x1
jax: 0.10.0
libtpu: 0.0.40
codegen_flags: <defaults>
</compile_context>

<pallas_src>
import functools

import jax
import jax.numpy as jnp
from jax.experimental import pallas as pl
from jax.experimental.pallas import tpu as pltpu


def _layernorm_kernel(x_ref, g_ref, b_ref, o_ref, *, hid_dim, eps):
    # x_ref: (tile_rows, hid_dim); g_ref / b_ref: (1, hid_dim)
    x = x_ref[...].astype(jnp.float32)
    n = float(hid_dim)

    # Fused single pass: sum and sum-of-squares together (both reduce on XLU).
    s = jnp.sum(x, axis=-1, keepdims=True)
    sq = jnp.sum(x * x, axis=-1, keepdims=True)
    mean = s * (1.0 / n)
    # torch's Tensor.std() is the *unbiased* estimator (divide by N-1).
    # NOTE: hid_dim == 1 gives NaN, same as torch.
    var = (sq - n * mean * mean) * (1.0 / (n - 1.0))
    var = jnp.maximum(var, 0.0)  # guard tiny negatives from cancellation
    std = jnp.sqrt(var)

    # Per-row reciprocal on a narrow (tile_rows, 1) column, then broadcast
    # multiply over the tile (cheaper than a full-tile divide). Exact
    # reciprocal keeps us bit-close to the reference at 1e-5 tolerance.
    inv = pl.reciprocal(std + eps, approx=False)

    out = (x - mean) * inv
    out = g_ref[...].astype(jnp.float32) * out + b_ref[...].astype(jnp.float32)
    o_ref[...] = out.astype(o_ref.dtype)


def _choose_tile_rows(rows, hid_dim, itemsize):
    TARGET_BLOCK_BYTES = 2 << 20  # ~2 MiB/block -> near HBM roofline
    MAX_TILE_ROWS = 2048
    MIN_GRID_STEPS = 16           # >= ~8 steps per core on a 2-core (v7x) chip
    row_bytes = max(1, hid_dim * itemsize)
    tr = TARGET_BLOCK_BYTES // row_bytes
    tr = min(tr, MAX_TILE_ROWS)
    tr = min(tr, max(1, -(-rows // MIN_GRID_STEPS)))  # keep enough grid steps
    tr = max(8, (tr // 8) * 8)                        # sublane multiple of 8
    return int(tr)


def layer_norm(x, gamma, beta, variance_epsilon=1e-12, tile_rows=None):
    """LayerNorm over the last axis, semantics matching the PyTorch module."""
    orig_shape = x.shape
    hid_dim = orig_shape[-1]
    rows = 1
    for d in orig_shape[:-1]:
        rows *= d

    x2 = x.reshape(rows, hid_dim)
    g2 = gamma.reshape(1, hid_dim)
    b2 = beta.reshape(1, hid_dim)

    itemsize = jnp.dtype(x.dtype).itemsize
    if tile_rows is None:
        tile_rows = _choose_tile_rows(rows, hid_dim, itemsize)

    grid = pl.cdiv(rows, tile_rows)

    # VMEM budget: double-buffered input + output blocks (in x.dtype) plus the
    # f32 temporaries inside the kernel, with headroom. Capped at 48 MiB so it
    # comfortably fits v7x's 64 MiB physical VMEM.
    block_bytes = tile_rows * hid_dim * itemsize
    f32_block = tile_rows * hid_dim * 4
    vmem_needed = 4 * block_bytes + 3 * f32_block + (2 << 20)
    vmem_limit = int(min(max(2 * vmem_needed, 32 << 20), 48 << 20))

    kernel = functools.partial(
        _layernorm_kernel, hid_dim=hid_dim, eps=variance_epsilon
    )

    out = pl.pallas_call(
        kernel,
        out_shape=jax.ShapeDtypeStruct((rows, hid_dim), x.dtype),
        grid_spec=pltpu.PrefetchScalarGridSpec(
            num_scalar_prefetch=0,
            grid=(grid,),
            in_specs=[
                pl.BlockSpec((tile_rows, hid_dim), lambda i: (i, 0)),
                pl.BlockSpec((1, hid_dim), lambda i: (0, 0)),
                pl.BlockSpec((1, hid_dim), lambda i: (0, 0)),
            ],
            out_specs=pl.BlockSpec((tile_rows, hid_dim), lambda i: (i, 0)),
        ),
        compiler_params=pltpu.CompilerParams(
            dimension_semantics=("parallel",),
            vmem_limit_bytes=vmem_limit,
        ),
    )(x2, g2, b2)

    return out.reshape(orig_shape)


def layer_norm_ref(x, gamma, beta, eps=1e-12):
    # Pure-JAX reference mirroring the PyTorch forward exactly.
    x32 = x.astype(jnp.float32)
    mean = jnp.mean(x32, axis=-1, keepdims=True)
    centered = x32 - mean
    var_unbiased = jnp.sum(centered * centered, axis=-1, keepdims=True) / (
        x.shape[-1] - 1
    )
    std = jnp.sqrt(var_unbiased)
    out = centered / (std + eps)
    return (gamma * out + beta).astype(x.dtype)


if __name__ == "__main__":
    key = jax.random.PRNGKey(0)
    k0, k1, k2 = jax.random.split(key, 3)

    # Small shapes; hidden dim kept lane-dense (multiple of 128) so output
    # stores are unmasked full-lane vst on TPU.
    batch, seq, hid_dim = 2, 8, 128
    x = jax.random.normal(k0, (batch, seq, hid_dim), dtype=jnp.float32)

    # Parameter init matching nn.Parameter(torch.ones/zeros(hid_dim)).
    gamma = jnp.ones((hid_dim,), dtype=jnp.float32)
    beta = jnp.zeros((hid_dim,), dtype=jnp.float32)

    out = layer_norm(x, gamma, beta, variance_epsilon=1e-12)
    out = jax.block_until_ready(out)
    ref = layer_norm_ref(x, gamma, beta)
    assert out.shape == x.shape
    assert jnp.allclose(out, ref, atol=1e-5, rtol=1e-5), "mismatch vs reference"

    # Second check with non-trivial gamma/beta and a row count that is not a
    # multiple of the tile (exercises the ragged last block / masked writes).
    gamma2 = jax.random.normal(k1, (hid_dim,), dtype=jnp.float32)
    beta2 = jax.random.normal(k2, (hid_dim,), dtype=jnp.float32)
    x2 = jax.random.normal(k1, (3, 7, hid_dim), dtype=jnp.float32)
    out2 = jax.block_until_ready(layer_norm(x2, gamma2, beta2))
    ref2 = layer_norm_ref(x2, gamma2, beta2)
    assert jnp.allclose(out2, ref2, atol=1e-5, rtol=1e-5), "mismatch (ragged)"

    print("KERNEL_OK")
</pallas_src>

<mosaic_0001>
module attributes {stable_mosaic.version = 11 : i64} {
  func.func @_layernorm_kernel(%arg0: i32, %arg1: memref<8x128xf32, #tpu.memory_space<vmem>>, %arg2: memref<1x128xf32, #tpu.memory_space<vmem>>, %arg3: memref<1x128xf32, #tpu.memory_space<vmem>>, %arg4: memref<8x128xf32, #tpu.memory_space<vmem>>) attributes {dimension_semantics = [#tpu.dimension_semantics<parallel>], iteration_bounds = array<i64: 2>, scalar_prefetch = 0 : i64, scratch_operands = 0 : i64, tpu.core_type = #tpu.core_type<tc>, window_params = [{transform_indices = @transform_0, window_bounds = array<i64: 8, 128>}, {pipeline_mode = #tpu.pipeline_mode<synchronous>, transform_indices = @transform_1, window_bounds = array<i64: 1, 128>}, {pipeline_mode = #tpu.pipeline_mode<synchronous>, transform_indices = @transform_2, window_bounds = array<i64: 1, 128>}, {transform_indices = @transform_3, window_bounds = array<i64: 8, 128>}]} {
    %c0 = arith.constant 0 : index
    %c0_0 = arith.constant 0 : index
    %0 = vector.load %arg1[%c0, %c0_0] : memref<8x128xf32, #tpu.memory_space<vmem>>, vector<8x128xf32>
    %cst = arith.constant dense<0.000000e+00> : vector<8xf32>
    %1 = vector.multi_reduction <add>, %0, %cst [1] : vector<8x128xf32> to vector<8xf32>
    %2 = vector.shape_cast %1 : vector<8xf32> to vector<8x1xf32>
    %3 = arith.mulf %0, %0 : vector<8x128xf32>
    %cst_1 = arith.constant dense<0.000000e+00> : vector<8xf32>
    %4 = vector.multi_reduction <add>, %3, %cst_1 [1] : vector<8x128xf32> to vector<8xf32>
    %5 = vector.shape_cast %4 : vector<8xf32> to vector<8x1xf32>
    %cst_2 = arith.constant 7.812500e-03 : f32
    %6 = vector.broadcast %cst_2 : f32 to vector<8x1xf32>
    %7 = arith.mulf %2, %6 : vector<8x1xf32>
    %cst_3 = arith.constant 1.280000e+02 : f32
    %8 = vector.broadcast %cst_3 : f32 to vector<8x1xf32>
    %9 = arith.mulf %8, %7 : vector<8x1xf32>
    %10 = arith.mulf %9, %7 : vector<8x1xf32>
    %11 = arith.subf %5, %10 : vector<8x1xf32>
    %cst_4 = arith.constant 0.00787401571 : f32
    %12 = vector.broadcast %cst_4 : f32 to vector<8x1xf32>
    %13 = arith.mulf %11, %12 : vector<8x1xf32>
    %cst_5 = arith.constant 0.000000e+00 : f32
    %14 = vector.broadcast %cst_5 : f32 to vector<8x1xf32>
    %15 = arith.maximumf %13, %14 : vector<8x1xf32>
    %16 = math.sqrt %15 : vector<8x1xf32>
    %cst_6 = arith.constant 9.99999996E-13 : f32
    %17 = vector.broadcast %cst_6 : f32 to vector<8x1xf32>
    %18 = arith.addf %16, %17 : vector<8x1xf32>
    %19 = tpu.reciprocal %18 : vector<8x1xf32> -> vector<8x1xf32>
    %20 = vector.broadcast %7 : vector<8x1xf32> to vector<8x128xf32>
    %21 = arith.subf %0, %20 : vector<8x128xf32>
    %22 = vector.broadcast %19 : vector<8x1xf32> to vector<8x128xf32>
    %23 = arith.mulf %21, %22 : vector<8x128xf32>
    %c0_7 = arith.constant 0 : index
    %c0_8 = arith.constant 0 : index
    %24 = vector.load %arg2[%c0_7, %c0_8] : memref<1x128xf32, #tpu.memory_space<vmem>>, vector<1x128xf32>
    %25 = vector.broadcast %24 : vector<1x128xf32> to vector<8x128xf32>
    %26 = arith.mulf %25, %23 : vector<8x128xf32>
    %c0_9 = arith.constant 0 : index
    %c0_10 = arith.constant 0 : index
    %27 = vector.load %arg3[%c0_9, %c0_10] : memref<1x128xf32, #tpu.memory_space<vmem>>, vector<1x128xf32>
    %28 = vector.broadcast %27 : vector<1x128xf32> to vector<8x128xf32>
    %29 = arith.addf %26, %28 : vector<8x128xf32>
    %c0_11 = arith.constant 0 : index
    %c0_12 = arith.constant 0 : index
    %30 = vector.load %arg4[%c0_11, %c0_12] : memref<8x128xf32, #tpu.memory_space<vmem>>, vector<8x128xf32>
    tpu.vector_store %arg4[%c0_11, %c0_12], %29 {strides = array<i32>} : memref<8x128xf32, #tpu.memory_space<vmem>>, vector<8x128xf32>,
    return
  }
  func.func @transform_0(%arg0: i32) -> (i32, i32) {
    %c0_i32 = arith.constant 0 : i32
    %c0_i32_0 = arith.constant 0 : i32
    return %arg0, %c0_i32 : i32, i32
  }
  func.func @transform_1(%arg0: i32) -> (i32, i32) {
    %c0_i32 = arith.constant 0 : i32
    %c0_i32_0 = arith.constant 0 : i32
    %c0_i32_1 = arith.constant 0 : i32
    return %c0_i32, %c0_i32_0 : i32, i32
  }
  func.func @transform_2(%arg0: i32) -> (i32, i32) {
    %c0_i32 = arith.constant 0 : i32
    %c0_i32_0 = arith.constant 0 : i32
    %c0_i32_1 = arith.constant 0 : i32
    return %c0_i32, %c0_i32_0 : i32, i32
  }
  func.func @transform_3(%arg0: i32) -> (i32, i32) {
    %c0_i32 = arith.constant 0 : i32
    %c0_i32_0 = arith.constant 0 : i32
    return %arg0, %c0_i32 : i32, i32
  }
}

</mosaic_0001>

<bundles_post_ra>
// kernel: tpu_custom_call.1
= control target key start
LH: loop header
LB: loop body
LE: loop exit
PB: predicated region body
PF: predicated region fallthrough
CT: control target
= control target key end

     0   :  { %8 = vsyncpa [#allocation3], 0  ;;  %s665_s0 = inlined_call_operand.hbm [shape: f32[16,128], index: 0, kind: input, shape index: {}]   ;;  %s666_s1 = inlined_call_operand.vmem [shape: f32[1,128], index: 1, kind: input, shape index: {}]   ;;  %s667_s2 = inlined_call_operand.vmem [shape: f32[1,128], index: 2, kind: input, shape index: {}]   ;;  %s668_s3 = inlined_call_operand.hbm [shape: f32[16,128], index: 3, kind: output, shape index: {}]  }
   0x1   :  { %10 = vsyncpa [#allocation3 + $0x1], 0 }
   0x2   :  { %11 = vsyncpa [#allocation4], 0 }
   0x3   :  { %13 = vsyncpa [#allocation4 + $0x1], 0  ;;  %s494_s12 = smov 0   ;;  %s496_s13 = smov 0  }
   0x4   :  { %s498_s14 = smov 0   ;;  %s500_s15 = smov 0  }
   0x5 LB: > { %s515_s16 = sadd.s32 4294967295, %s470_s15   ;;  %s310_s17 = sadd.s32 4294967294, %s470_s15   ;;  %s470_s15 = sphi %s500_s15, %s683_s15   ;;  %s466_s14 = sphi %s498_s14, %s682_s14   ;;  %s462_s13 = sphi %s496_s13, %s681_s13   ;;  %s458_s12 = sphi %s494_s12, %s680_s12  }
   0x6   : > { %s519_s18 = sadd.s32 1, %s470_s15   ;;  %s26_s19 = sadd.s32 1, %s466_s14 }
   0x7   : > { %s23_s20 = ssub.s32 %s470_s15, %s519_s18  ;;  %p33_p0 = scmp.ne.s32.totalorder %s466_s14, %s462_s13 }
   0x8   : > { %p24_p1 = scmp.eq.s32.totalorder %s23_s20, 0  ;;  %p34_p2 = scmp.eq.s32.totalorder %s470_s15, 0 }
   0x9   : > { %p39_p3 = scmp.ne.s32.totalorder %s462_s13, %s458_s12  ;;  %p40_p4 = scmp.eq.s32.totalorder %s515_s16, 0 }
   0xa   : > { %s531_s21 = scalar_select %p24_p1, %s466_s14, %s26_s19  }
   0xb   : > { %p533_p5 = por %p34_p2, %p33_p0  ;;  %p537_p6 = por %p40_p4, %p39_p3 }
   0xc   : > { %p105_p7 = scmp.eq.s32.totalorder %s515_s16, 1  ;;  %p111_p8 = scmp.eq.s32.totalorder %s310_s17, 1 }
   0xd   : > { %p336_p10 = scmp.lt.s32.totalorder %s470_s15, 2  ;;  %s137_s26 = sand.u32 1, %s466_s14  }
   0xe   : > { %p544_p11 = por %p105_p7, %p33_p0  ;;  %p548_p12 = por %p111_p8, %p39_p3 }
   0xf   : > { %s314_s27 = sshll.u32 %s470_s15, 7  ;;  %s313_s28 = sshll.u32 %s137_s26, 3 }
  0x10   : > { %s672_s24 = scalar_select %p544_p11, 1, 0 }
  0x11   : > { %s673_s25 = scalar_select %p548_p12, 1, 0 }
  0x12   : > { %s557_s4 = scalar_lea.hbm %s665_s0, %s314_s27  ;;  %s141_s5 = scalar_lea.vmem [#allocation2], %s313_s28 }
  0x13   : > { %s148_s6 = sshll.u32 %s141_s5, 4  ;;  %p561_p13 = pnand %p336_p10, %p533_p5  ;;  %s565_s6 = int_to_ptr.vmem [resolvable:$true] %s148_s6 }
  0x14   : > { %s138_s8 = scalar_lea.sflag [#allocation3], %s137_s26  ;;  %s374_s9 = scalar_lea.hbm %s557_s4, 128 }
  0x15   : > { %p375_p2 = scmp.ne.s32.totalorder %s557_s4, %s374_s9  ;;  %p376_p3 = pneg %p561_p13 }
  0x16   : > { %s379_s17 = scalar_lea.hbm %s665_s0, 256  ;;  %p380_p5 = scmp.lt.u32.totalorder %s557_s4, %s665_s0 }
  0x17   : > { %p377_p4 = pnand %p376_p3, %p375_p2  ;;  %p381_p8 = scmp.lt.u32.totalorder %s379_s17, %s374_s9 }
  0x18   : > { %p383_p9 = scmp.lt.u32.totalorder %s374_s9, %s557_s4 }
  0x19   : > { %p378_p7 = pneg %p377_p4  ;;  %p382_p10 = por %p381_p8, %p380_p5 }
  0x1b   : > { %p384_p0 = por %p383_p9, %p382_p10 }
  0x1d   : > { %p385_p1 = pnand %p384_p0, %p378_p7 }
  0x1f   : > { %388 = shalt.err (!%p385_p1)
}
  0x20   : > { %s389_s22 = scalar_lea.vmem %s565_s6, 128  ;;  %s472_s26 = smov [#allocation2]  }
  0x21   : > { %p390_p2 = scmp.ne.s32.totalorder %s565_s6, %s389_s22  ;;  %s394_s27 = sshll.u32 %s472_s26, 4  ;;  %s395_s27 = int_to_ptr.vmem [resolvable:$false] %s394_s27 }
  0x22   : > { %s396_s28 = scalar_lea.vmem %s395_s27, 256  ;;  %p397_p11 = scmp.lt.s32.totalorder %s565_s6, %s395_s27 }
  0x23   : > { %p392_p4 = pnand %p390_p2, %p376_p3  ;;  %p398_p5 = scmp.lt.s32.totalorder %s396_s28, %s389_s22 }
  0x25   : > { %p393_p12 = pneg %p392_p4  ;;  %p399_p8 = por %p398_p5, %p397_p11 }
  0x27   : > { %p400_p9 = pnand %p399_p8, %p393_p12 }
  0x29   : > { %403 = shalt.err (!%p400_p9)
}
  0x2a   : > { %331 = dma.hbm_to_vmem [thread:$0]  (!%p561_p13), %s557_s4, 128, %s565_s6, %s138_s8  }
  0x2b   : > { %p675_p0 = scmp.lt.s32.totalorder %s470_s15, 3  ;;  %p676_p1 = scmp.ge.s32.totalorder %s470_s15, 1 }
  0x2d   : > { %p154_p3 = pnand %p676_p1, %p675_p0 }
  0x2e   : > { %s599_s29 = sand.u32 (!%p154_p3), 1, %s462_s13  }
  0x2f   : > { %157 = sbr.rel (%p154_p3) target bundleno = 258 (0x102), region = 32  ;;  %s316_s30 = sshll.u32 (!%p154_p3), %s599_s29, 3 }
  0x30   : > { %s160_s5 = scalar_lea.sflag (!%p154_p3), [#allocation3], %s599_s29  ;;  %s163_s7 = scalar_lea.vmem (!%p154_p3), [#allocation2], %s316_s30 }
  0x36   : > { %449 = dma.done.wait (%p537_p6), %s160_s5, 128  }
  0x37   : > { %451 = vsyncadd (%p537_p6), %s160_s5, 4294967168  ;;  %v186_v0 = vld [vmem:[%s163_s7] sm:$0xff]  ;;  %s321_s9 = sshll.u32 %s515_s16, 7  ;;  %s185_s10 = scalar_lea.vmem [#allocation5], %s316_s30 }
  0x38   : > { %187 = vadd.xlane.f32.xlu0 %v186_v0  ;;  %v189_v1 = vmul.f32 %v186_v0, %v186_v0  ;;  %v318_v18 = vld [vmem:[%s666_s1] ss:$0 sm:$0xff]  ;;  %s240_s11 = sshll.u32 %s185_s10, 4  ;;  %s621_s20 = scalar_lea.hbm %s668_s3, %s321_s9  ;;  %s623_s11 = int_to_ptr.vmem [resolvable:$true] %s240_s11 }
  0x39   : > { %v319_v20 = vld [vmem:[%s667_s2] ss:$0 sm:$0xff]  ;;  %s227_s22 = scalar_lea.sflag [#allocation4], %s599_s29  ;;  %s404_s26 = scalar_lea.vmem %s623_s11, 128 }
  0x3a   : > { %p405_p6 = scmp.ne.s32.totalorder %s623_s11, %s404_s26  ;;  %p677_p11 = scmp.ne.s32.totalorder %s672_s24, 0 }
  0x3b   : > { %s473_s16 = smov [#allocation5]  }
  0x3c   : > { %190 = vadd.xlane.f32.xlu0 %v189_v1  ;;  %p406_p12 = pnand %p405_p6, %p677_p11  ;;  %s408_s27 = sshll.u32 %s473_s16, 4  ;;  %s409_s27 = int_to_ptr.vmem [resolvable:$false] %s408_s27 }
  0x3d   : > { %s410_s28 = scalar_lea.vmem %s409_s27, 256  ;;  %p411_p7 = scmp.lt.s32.totalorder %s623_s11, %s409_s27 }
  0x3e   : > { %p407_p13 = pneg %p406_p12  ;;  %p412_p10 = scmp.lt.s32.totalorder %s410_s28, %s404_s26 }
  0x40   : > { %p413_p2 = por %p412_p10, %p411_p7 }
  0x42   : > { %p414_p4 = pnand %p413_p2, %p407_p13 }
  0xc5   : > { %v188_v2 = vpop.xlane.xlu0 %187 }
  0xc6   : > { %v192_v3 = vmul.f32 0.0078125, %v188_v2 }
  0xc8   : > { %v193_v4 = vmul.f32 128.0, %v192_v3  ;;  %v207_v16 = vsub.f32 %v186_v0, %v192_v3 }
  0xc9   : > { %v191_v5 = vpop.xlane.xlu0 %190 }
  0xca   : > { %v194_v6 = vmul.f32 %v193_v4, %v192_v3 }
  0xcc   : > { %v195_v7 = vsub.f32 %v191_v5, %v194_v6 }
  0xce   : > { %v196_v8 = vmul.f32 0.007874016, %v195_v7 }
  0xd0   : > { %v197_v9 = vmax.f32 %v196_v8, 0.0 }
  0xd2   : > { %370 = vrsqrt.f32 %v197_v9  ;;  %vm200_vm0 = vcmp.eq.f32.partialorder %v197_v9, inf  ;;  %v203_v12 = vand.u32 2147483648, %v197_v9  ;;  %vm202_vm1 = vcmp.eq.f32.partialorder %v197_v9, 0.0 }
  0xdc   : > { %v371_v10 = vpop.eup %370 }
  0xdd   : > { %v199_v11 = vmul.f32 %v371_v10, %v197_v9 }
  0xdf   : > { %v201_v13 = vsel %vm200_vm0, %v197_v9, %v199_v11 }
  0xe0   : > { %v204_v14 = vsel %vm202_vm1, %v203_v12, %v201_v13 }
  0xe1   : > { %v205_v15 = vadd.f32 1e-12, %v204_v14 }
  0xe3   : > { %372 = vrcp.f32 %v205_v15 }
  0xed   : > { %v373_v17 = vpop.eup %372 }
  0xee   : > { %v208_v19 = vmul.f32 %v373_v17, %v207_v16 }
  0xf0   : > { %v216_v21 = vmul.f32 %v318_v18, %v208_v19 }
  0xf2   : > { %v224_v22 = vadd.f32 %v319_v20, %v216_v21 }
  0xf4   : > { %225 = vst [vmem:[%s185_s10] sm:$0xff] %v224_v22 }
  0xf5   : > { %417 = shalt.err (!%p414_p4)
}
  0xf6   : > { %s418_s29 = scalar_lea.hbm %s621_s20, 128  ;;  %s422_s7 = scalar_lea.hbm %s668_s3, 256 }
  0xf7   : > { %p419_p5 = scmp.ne.s32.totalorder %s621_s20, %s418_s29  ;;  %p423_p0 = scmp.lt.u32.totalorder %s621_s20, %s668_s3 }
  0xf8   : > { %p424_p1 = scmp.lt.u32.totalorder %s422_s7, %s418_s29  ;;  %p426_p6 = scmp.lt.u32.totalorder %s418_s29, %s621_s20 }
  0xf9   : > { %p420_p8 = pnand %p419_p5, %p677_p11 }
  0xfa   : > { %p425_p3 = por %p424_p1, %p423_p0 }
  0xfb   : > { %p421_p9 = pneg %p420_p8 }
  0xfc   : > { %p427_p12 = por %p426_p6, %p425_p3 }
  0xfe   : > { %p428_p13 = pnand %p427_p12, %p421_p9 }
 0x100   : > { %431 = shalt.err (!%p428_p13)
}
 0x101   : > { %326 = dma.vmem_to_hbm [thread:$0]  (%p677_p11), %s623_s11, 128, %s621_s20, %s227_s22  }
 0x102 PF: > { %s252_s6 = sand.u32 1, %s458_s12   ;;  %p678_p7 = scmp.ne.s32.totalorder %s673_s25, 0 }
 0x103   : > { %p679_p10 = scmp.ge.s32.totalorder %s470_s15, 2  ;;  %s253_s8 = scalar_lea.sflag [#allocation4], %s252_s6 }
 0x105   : > { %p333_p2 = pnand %p679_p10, %p678_p7 }
 0x107   : > { %453 = dma.done.wait (!%p333_p2), %s253_s8, 128  }
 0x108   : > { %455 = vsyncadd (!%p333_p2), %s253_s8, 4294967168  ;;  %p16_p4 = scmp.ge.s32.totalorder %s519_s18, 4   ;;  %s680_s12 = smov %s462_s13 }
 0x109   : > { %s681_s13 = smov %s466_s14  ;;  %s682_s14 = smov %s531_s21 }
 0x10a   : > { %s683_s15 = smov %s519_s18  ;;  %18 = sbr.rel (!%p16_p4) target bundleno = 5 (0x5), region = 77 }
 0x111   :  { %258 = vsyncpa [#allocation3], 1 }
 0x112   :  { %260 = vsyncpa [#allocation3 + $0x1], 1 }
 0x113   :  { %261 = vsyncpa [#allocation4], 1 }
 0x114   :  { %263 = vsyncpa [#allocation4 + $0x1], 1 }

</bundles_post_ra>
